<compile_context>
chip_gen: v7x
topology: tpu7x:2x2x1
jax: 0.10.0
libtpu: 0.0.40
codegen_flags: <defaults>
</compile_context>

<pallas_src>
import functools

import jax
import jax.numpy as jnp
from jax.experimental import pallas as pl
from jax.experimental.pallas import tpu as pltpu

IN_FEATURES = 30
HIDDEN = 16
DEFAULT_BATCH_TILE = 8192   # rows per grid step (multiple of 128)
MIN_PALLAS_BATCH = 2048     # below this, a fused XLA path beats any custom call


def _round_up(x, m):
    return (x + m - 1) // m * m


def _choose_tile(batch, batch_tile):
    """Pick a 128-aligned batch tile giving a near-even split into >=2 steps."""
    b128 = _round_up(max(batch, 1), 128)
    n_steps = pl.cdiv(b128, batch_tile)
    # Guarantee >=2 grid steps when the batch allows it so the "parallel" grid
    # axis can be sharded across v7x's two TensorCores (neutral on v5e/v6e).
    if n_steps == 1 and b128 >= 2 * 128:
        n_steps = 2
    tb = _round_up(pl.cdiv(b128, n_steps), 128)
    n_steps = pl.cdiv(batch, tb)   # actual grid size over the real (unpadded) batch
    return tb, n_steps


def net_kernel(x_ref, w1_ref, b1_ref, w2_ref, b2_ref, o_ref):
    # Transpose the batch tile once on the XLU so every subsequent op is
    # lane-dense: (TB, 30) -> (30, TB).
    xt = x_ref[...].T
    # fc1 (transposed): (16, 30) @ (30, TB) -> (16, TB), f32 MXU accumulation.
    ht = jnp.dot(w1_ref[...], xt, preferred_element_type=jnp.float32)
    ht = jnp.maximum(ht + b1_ref[...], 0.0)          # bias (16,1) bcast + ReLU
    # Dropout(p=0.2, training=self.training): inference mode => identity.
    # TODO(synk): add a pltpu.prng_* dropout mask if a training-mode kernel is needed.
    # fc2 (transposed): (1, 16) @ (16, TB) -> lane-dense (1, TB).
    z = jnp.dot(w2_ref[...], ht, preferred_element_type=jnp.float32)
    z = z + b2_ref[0]                                # scalar fc2 bias from SMEM
    o_ref[...] = jax.nn.sigmoid(z).astype(o_ref.dtype)


@functools.partial(jax.jit, static_argnames=("batch_tile", "min_pallas_batch"))
def net_forward(x, w1, b1, w2, b2, *, batch_tile=DEFAULT_BATCH_TILE,
                min_pallas_batch=MIN_PALLAS_BATCH):
    """Forward pass.  Parameters use the PyTorch layouts:
    w1: (16, 30), b1: (16,), w2: (1, 16), b2: (1,)."""
    B = x.shape[0]
    assert x.shape[1] == IN_FEATURES

    x = x.astype(jnp.float32)                                   # no-op if already f32
    w1 = jnp.reshape(w1, (HIDDEN, IN_FEATURES)).astype(jnp.float32)
    b1_col = jnp.reshape(b1, (HIDDEN, 1)).astype(jnp.float32)
    w2_row = jnp.reshape(w2, (1, HIDDEN)).astype(jnp.float32)
    b2_vec = jnp.reshape(b2, (1,)).astype(jnp.float32)

    if B < min_pallas_batch:
        # Small-batch fast path: fused XLA dot + bias + ReLU + dot + sigmoid.
        h = jnp.maximum(x @ w1.T + b1_col.T, 0.0)
        return jax.nn.sigmoid(h @ w2_row.T + b2_vec[None, :])

    tb, n_steps = _choose_tile(B, batch_tile)
    out_cols = n_steps * tb

    param_bytes = (HIDDEN * IN_FEATURES + HIDDEN + HIDDEN + 1) * 4
    cost = pl.CostEstimate(
        flops=2 * B * (IN_FEATURES * HIDDEN + HIDDEN),
        transcendentals=B,                                      # sigmoid
        bytes_accessed=B * (IN_FEATURES * 4 + 4) + param_bytes,
    )

    out_row = pl.pallas_call(
        net_kernel,
        out_shape=jax.ShapeDtypeStruct((1, out_cols), jnp.float32),
        grid=(n_steps,),
        in_specs=[
            # x tiled over the batch; the final block is clamped by Pallas if
            # B is not a multiple of tb (no wrapper-side pad copy).
            pl.BlockSpec((tb, IN_FEATURES), lambda i: (i, 0)),
            pl.BlockSpec((HIDDEN, IN_FEATURES), lambda i: (0, 0)),  # w1 resident
            pl.BlockSpec((HIDDEN, 1), lambda i: (0, 0)),            # b1 resident
            pl.BlockSpec((1, HIDDEN), lambda i: (0, 0)),            # w2 resident
            pl.BlockSpec(memory_space=pltpu.MemorySpace.SMEM),      # b2 scalar
        ],
        out_specs=pl.BlockSpec((1, tb), lambda i: (0, i)),          # lane-dense rows
        compiler_params=pltpu.CompilerParams(
            dimension_semantics=("parallel",),
            vmem_limit_bytes=48 * 1024 * 1024,   # headroom; < v7x 64 MiB physical
        ),
        cost_estimate=cost,
    )(x, w1, b1_col, w2_row, b2_vec)

    # (1, n_steps*tb) lane-dense slab -> (B, 1) column expected by the module.
    return out_row.reshape(out_cols, 1)[:B]


def init_params(key):
    # Same shapes / init ranges as the PyTorch module (weights in PyTorch
    # (out_features, in_features) layout).
    k1, k2, k3, k4 = jax.random.split(key, 4)
    lim1 = 1.0 / jnp.sqrt(float(IN_FEATURES))
    lim2 = 1.0 / jnp.sqrt(float(HIDDEN))
    w1 = jax.random.uniform(k1, (HIDDEN, IN_FEATURES), jnp.float32, -lim1, lim1)
    b1 = jax.random.uniform(k2, (HIDDEN,), jnp.float32, -lim1, lim1)
    w2 = jax.random.uniform(k3, (1, HIDDEN), jnp.float32, -lim2, lim2)
    b2 = jax.random.uniform(k4, (1,), jnp.float32, -lim2, lim2)
    return w1, b1, w2, b2


if __name__ == "__main__":
    key = jax.random.PRNGKey(0)
    kx, kp = jax.random.split(key)
    w1, b1, w2, b2 = init_params(kp)

    def reference(x):
        # Pure-JAX f32 reference (eval-mode dropout = identity).
        h = jnp.maximum(x @ w1.T + b1[None, :], 0.0)
        return jax.nn.sigmoid(h @ w2.T + b2[None, :])

    # Exercise the Pallas path (forced) at two small batches: one single
    # clamped tile and one two-step grid with a partial last tile.
    for B in (8, 300):
        x = jax.random.normal(jax.random.fold_in(kx, B), (B, IN_FEATURES),
                              jnp.float32)
        out = net_forward(x, w1, b1, w2, b2, min_pallas_batch=0)
        out = jax.block_until_ready(out)
        ref = reference(x)
        assert out.shape == (B, 1)
        assert jnp.allclose(out, ref, atol=1e-4, rtol=1e-4)

    # Default dispatch for a tiny batch uses the fused XLA fast path.
    x_small = jax.random.normal(kx, (8, IN_FEATURES), jnp.float32)
    out_fast = jax.block_until_ready(net_forward(x_small, w1, b1, w2, b2))
    assert out_fast.shape == (8, 1)
    assert jnp.allclose(out_fast, reference(x_small), atol=1e-4, rtol=1e-4)

    print("KERNEL_OK")
</pallas_src>

<mosaic_0001>
module attributes {stable_mosaic.version = 11 : i64} {
  func.func @net_kernel(%arg0: i32, %arg1: memref<128x30xf32, #tpu.memory_space<vmem>>, %arg2: memref<16x30xf32, #tpu.memory_space<vmem>>, %arg3: memref<16x1xf32, #tpu.memory_space<vmem>>, %arg4: memref<1x16xf32, #tpu.memory_space<vmem>>, %arg5: memref<1xf32, #tpu.memory_space<smem>>, %arg6: memref<1x128xf32, #tpu.memory_space<vmem>>) attributes {dimension_semantics = [#tpu.dimension_semantics<parallel>], iteration_bounds = array<i64: 1>, scalar_prefetch = 0 : i64, scratch_operands = 0 : i64, tpu.core_type = #tpu.core_type<tc>, window_params = [{transform_indices = @transform_0, window_bounds = array<i64: 128, 30>}, {pipeline_mode = #tpu.pipeline_mode<synchronous>, transform_indices = @transform_1, window_bounds = array<i64: 16, 30>}, {pipeline_mode = #tpu.pipeline_mode<synchronous>, transform_indices = @transform_2, window_bounds = array<i64: 16, 1>}, {pipeline_mode = #tpu.pipeline_mode<synchronous>, transform_indices = @transform_3, window_bounds = array<i64: 1, 16>}, {transform_indices = @transform_4, window_bounds = array<i64: 1>}, {transform_indices = @transform_5, window_bounds = array<i64: 1, 128>}]} {
    %c0 = arith.constant 0 : index
    %c0_0 = arith.constant 0 : index
    %0 = vector.load %arg1[%c0, %c0_0] : memref<128x30xf32, #tpu.memory_space<vmem>>, vector<128x30xf32>
    %1 = tpu.transpose %0, [1, 0] : vector<128x30xf32> -> vector<30x128xf32>
    %c0_1 = arith.constant 0 : index
    %c0_2 = arith.constant 0 : index
    %2 = vector.load %arg2[%c0_1, %c0_2] : memref<16x30xf32, #tpu.memory_space<vmem>>, vector<16x30xf32>
    %cst = arith.constant dense<0.000000e+00> : vector<16x128xf32>
    %3 = tpu.matmul %2, %1, %cst {dimension_numbers = #tpu.dot_dimension_numbers<[1], [0], [0], [1], [0, 0, 1, 1], [], []>} : vector<16x30xf32>, vector<30x128xf32>, vector<16x128xf32> -> vector<16x128xf32>
    %c0_3 = arith.constant 0 : index
    %c0_4 = arith.constant 0 : index
    %4 = vector.load %arg3[%c0_3, %c0_4] : memref<16x1xf32, #tpu.memory_space<vmem>>, vector<16x1xf32>
    %5 = vector.broadcast %4 : vector<16x1xf32> to vector<16x128xf32>
    %6 = arith.addf %3, %5 : vector<16x128xf32>
    %cst_5 = arith.constant 0.000000e+00 : f32
    %7 = vector.broadcast %cst_5 : f32 to vector<16x128xf32>
    %8 = arith.maximumf %6, %7 : vector<16x128xf32>
    %c0_6 = arith.constant 0 : index
    %c0_7 = arith.constant 0 : index
    %9 = vector.load %arg4[%c0_6, %c0_7] : memref<1x16xf32, #tpu.memory_space<vmem>>, vector<1x16xf32>
    %cst_8 = arith.constant dense<0.000000e+00> : vector<1x128xf32>
    %10 = tpu.matmul %9, %8, %cst_8 {dimension_numbers = #tpu.dot_dimension_numbers<[1], [0], [0], [1], [0, 0, 1, 1], [], []>} : vector<1x16xf32>, vector<16x128xf32>, vector<1x128xf32> -> vector<1x128xf32>
    %c0_9 = arith.constant 0 : index
    %11 = memref.load %arg5[%c0_9] : memref<1xf32, #tpu.memory_space<smem>>
    %12 = vector.broadcast %11 : f32 to vector<1x128xf32>
    %13 = arith.addf %10, %12 : vector<1x128xf32>
    %14 = arith.negf %13 : vector<1x128xf32>
    %15 = math.exp %14 : vector<1x128xf32>
    %cst_10 = arith.constant 1.000000e+00 : f32
    %16 = vector.broadcast %cst_10 : f32 to vector<1x128xf32>
    %17 = arith.addf %16, %15 : vector<1x128xf32>
    %18 = arith.divf %16, %17 : vector<1x128xf32>
    %c0_11 = arith.constant 0 : index
    %c0_12 = arith.constant 0 : index
    %19 = vector.load %arg6[%c0_11, %c0_12] : memref<1x128xf32, #tpu.memory_space<vmem>>, vector<1x128xf32>
    tpu.vector_store %arg6[%c0_11, %c0_12], %18 {strides = array<i32>} : memref<1x128xf32, #tpu.memory_space<vmem>>, vector<1x128xf32>,
    return
  }
  func.func @transform_0(%arg0: i32) -> (i32, i32) {
    %c0_i32 = arith.constant 0 : i32
    %c0_i32_0 = arith.constant 0 : i32
    return %arg0, %c0_i32 : i32, i32
  }
  func.func @transform_1(%arg0: i32) -> (i32, i32) {
    %c0_i32 = arith.constant 0 : i32
    %c0_i32_0 = arith.constant 0 : i32
    %c0_i32_1 = arith.constant 0 : i32
    return %c0_i32, %c0_i32_0 : i32, i32
  }
  func.func @transform_2(%arg0: i32) -> (i32, i32) {
    %c0_i32 = arith.constant 0 : i32
    %c0_i32_0 = arith.constant 0 : i32
    %c0_i32_1 = arith.constant 0 : i32
    return %c0_i32, %c0_i32_0 : i32, i32
  }
  func.func @transform_3(%arg0: i32) -> (i32, i32) {
    %c0_i32 = arith.constant 0 : i32
    %c0_i32_0 = arith.constant 0 : i32
    %c0_i32_1 = arith.constant 0 : i32
    return %c0_i32, %c0_i32_0 : i32, i32
  }
  func.func @transform_4(%arg0: i32) -> i32 {
    %c0_i32 = arith.constant 0 : i32
    %c0_i32_0 = arith.constant 0 : i32
    return %c0_i32 : i32
  }
  func.func @transform_5(%arg0: i32) -> (i32, i32) {
    %c0_i32 = arith.constant 0 : i32
    %c0_i32_0 = arith.constant 0 : i32
    return %c0_i32, %arg0 : i32, i32
  }
}

</mosaic_0001>

<bundles_post_ra>
// kernel: net_forward.1
= control target key start
LH: loop header
LB: loop body
LE: loop exit
PB: predicated region body
PF: predicated region fallthrough
CT: control target
= control target key end

     0   :  { %vm51_vm0 = vcmask 244736   ;;  %v414_v3 = vmov 0   ;;  %v415_v30 = vmov 0.0|0.0   ;;  %vm416_vm2 = vmmov 0   ;;  %s557_s0 = inlined_call_operand.vmem [shape: f32[8,30], index: 0, kind: input, shape index: {}]   ;;  %s558_s1 = inlined_call_operand.vmem [shape: f32[16,30], index: 1, kind: input, shape index: {}]   ;;  %s559_s2 = inlined_call_operand.vmem [shape: f32[16,1], index: 2, kind: input, shape index: {}]   ;;  %s560_s3 = inlined_call_operand.vmem [shape: f32[1,16], index: 3, kind: input, shape index: {}]   ;;  %s561_s4 = inlined_call_operand.<no memory space> [shape: f32[1], index: 4, kind: input, shape index: {}]   ;;  %s562_s5 = inlined_call_operand.vmem [shape: f32[1,128], index: 5, kind: output, shape index: {}]  }
   0x1   :  { %v21_v0 = vld [vmem:[%s557_s0] sm:$0xff]  ;;  %v22_v1 = vld [vmem:[%s557_s0 + $0x8] sm:$0xff]  ;;  %vm456_vm1 = vmpackc.low %vm51_vm0, %vm51_vm0  ;;  %409 = vset.pattern.permute.xlu0 %v414_v3  ;;  %402 = vmatprep.subr.bf16.mxu1 %v415_v30  ;;  %v417_v31 = vmov 0.0   ;;  %vm186_vm3 = vcmask 130048   ;;  %v185_v42 = vstv %s561_s4 }
   0x2   :  { %v354_v4 = vpack.c.bf16 %v22_v1, %v21_v0  ;;  %v23_v5 = vld [vmem:[%s557_s0 + $0x10] sm:$0xff]  ;;  %v24_v6 = vld [vmem:[%s557_s0 + $0x18] sm:$0xff]  ;;  %v37_v8 = vld [vmem:[%s558_s1] sm:$0xff]  ;;  %351 = vmatprep.mubr.msk.f32.mxu1 %vm416_vm2, %v417_v31 }
   0x3   :  { %v360_v7 = vpack.c.bf16 %v24_v6, %v23_v5  ;;  %v25_v9 = vld [vmem:[%s557_s0 + $0x20] sm:$0xff]  ;;  %v26_v10 = vld [vmem:[%s557_s0 + $0x28] sm:$0xff]  ;;  %344 = vmatprep.mubr.msk.f32.mxu0 %vm51_vm0, %v37_v8  ;;  %v27_v14 = vld [vmem:[%s557_s0 + $0x30] sm:$0xff] }
   0x4   :  { %356 = vmatprep.subr.msk.bf16.mxu0 %vm456_vm1, %v354_v4  ;;  %v39_v11 = vld [vmem:[%s559_s2] sm:$0xff]  ;;  %v40_v12 = vld [vmem:[%s559_s2 + $0x8] sm:$0xff]  ;;  %v366_v13 = vpack.c.bf16 %v26_v10, %v25_v9  ;;  %v28_v15 = vld [vmem:[%s557_s0 + $0x38] sm:$0xff] }
   0x5   :  { %359 = vmatpush3.bf16.xpose.msk.msra.mxu0 %vm456_vm1, %v354_v4  ;;  %43 = vperm.xlu0 %409, %v39_v11   ;;  %v372_v16 = vpack.c.bf16 %v28_v15, %v27_v14  ;;  %v29_v17 = vld [vmem:[%s557_s0 + $0x40] sm:$0xff]  ;;  %v30_v18 = vld [vmem:[%s557_s0 + $0x48] sm:$0xff]  ;;  %v31_v20 = vld [vmem:[%s557_s0 + $0x50] sm:$0xff] }
   0x6   :  { %362 = vmatprep.subr.msk.bf16.mxu0 %vm456_vm1, %v360_v7  ;;  %v378_v19 = vpack.c.bf16 %v30_v18, %v29_v17  ;;  %v32_v21 = vld [vmem:[%s557_s0 + $0x58] sm:$0xff]  ;;  %v33_v23 = vld [vmem:[%s557_s0 + $0x60] sm:$0xff]  ;;  %v34_v24 = vld [vmem:[%s557_s0 + $0x68] sm:$0xff] }
   0x7   :  { %v384_v22 = vpack.c.bf16 %v32_v21, %v31_v20  ;;  %v390_v25 = vpack.c.bf16 %v34_v24, %v33_v23  ;;  %v35_v26 = vld [vmem:[%s557_s0 + $0x70] sm:$0xff]  ;;  %v36_v27 = vld [vmem:[%s557_s0 + $0x78] sm:$0xff]  ;;  %v38_v29 = vld [vmem:[%s558_s1 + $0x8] sm:$0xff] }
   0x8   :  { %v396_v28 = vpack.c.bf16 %v36_v27, %v35_v26  ;;  %v183_v41 = vld [vmem:[%s560_s3] sm:$0x1] }
   0x9   :  { %48 = vperm.xlu0 %409, %v40_v12  }
   0xd   :  { %365 = vmatpush3.bf16.xpose.msk.msra.mxu0 %vm456_vm1, %v360_v7 }
   0xe   :  { %368 = vmatprep.subr.msk.bf16.mxu0 %vm456_vm1, %v366_v13 }
  0x15   :  { %371 = vmatpush3.bf16.xpose.msk.msra.mxu0 %vm456_vm1, %v366_v13 }
  0x16   :  { %374 = vmatprep.subr.msk.bf16.mxu0 %vm456_vm1, %v372_v16 }
  0x1d   :  { %377 = vmatpush3.bf16.xpose.msk.msra.mxu0 %vm456_vm1, %v372_v16 }
  0x1e   :  { %380 = vmatprep.subr.msk.bf16.mxu0 %vm456_vm1, %v378_v19 }
  0x25   :  { %383 = vmatpush3.bf16.xpose.msk.msra.mxu0 %vm456_vm1, %v378_v19 }
  0x26   :  { %386 = vmatprep.subr.msk.bf16.mxu0 %vm456_vm1, %v384_v22 }
  0x2d   :  { %389 = vmatpush3.bf16.xpose.msk.msra.mxu0 %vm456_vm1, %v384_v22 }
  0x2e   :  { %392 = vmatprep.subr.msk.bf16.mxu0 %vm456_vm1, %v390_v25 }
  0x35   :  { %395 = vmatpush3.bf16.xpose.msk.msra.mxu0 %vm456_vm1, %v390_v25 }
  0x36   :  { %398 = vmatprep.subr.msk.bf16.mxu0 %vm456_vm1, %v396_v28 }
  0x3d   :  { %401 = vmatpush3.bf16.xpose.msk.msra.mxu0 %vm456_vm1, %v396_v28 }
  0x44   :  { %345 = vmatmul.mubr.msk.f32.vlgmr.msra.gmra.mrb[0].mxu0 %vm51_vm0, %v38_v29 }
  0x84   :  { %v44_v32 = vpop.permute.xlu0 %43 }
  0x88   :  { %v49_v33 = vpop.permute.xlu0 %48 }
 0x117   :  { %v346_v34 = vpop.f32.mrb[0].mxu0 }
 0x118   :  { %v178_v35 = vadd.f32 %v346_v34, %v49_v33  ;;  %v172_v36 = vpop.f32.mrb[1].mxu0 }
 0x119   :  { %v173_v37 = vadd.f32 %v172_v36, %v44_v32 }
 0x11a   :  { %v182_v38 = vmax.f32 %v178_v35, 0.0 }
 0x11b   :  { %v181_v39 = vmax.f32 %v173_v37, 0.0 }
 0x11d   :  { %v403_v40 = vpack.c.bf16 %v182_v38, %v181_v39 }
 0x11f   :  { %404 = vmatpush3.bf16.msra.mxu1 %v403_v40 }
 0x122   :  { %352 = vmatmul.mubr.msk.f32.vlgmr.msra.gmra.mrb[0].mxu1 %vm186_vm3, %v183_v41 }
 0x1f5   :  { %v256_v43 = vpop.f32.mrb[0].mxu1 }
 0x1f6   :  { %v257_v44 = vadd.f32 %v256_v43, %v185_v42  ;;  %v353_v45 = vpop.f32.mrb[1].mxu1 }
 0x1f8   :  { %v290_v46 = vmul.f32 -1.442695, %v257_v44 }
 0x1fa   :  { %410 = vpow2.f32 %v290_v46 }
 0x204   :  { %v411_v47 = vpop.eup %410 }
 0x205   :  { %v263_v48 = vadd.f32 1.0, %v411_v47 }
 0x207   :  { %412 = vrcp.f32 %v263_v48 }
 0x211   :  { %v413_v49 = vpop.eup %412 }
 0x212   :  { %266 = vst [vmem:[%s562_s5] sm:$0x1] %v413_v49 }

</bundles_post_ra>
